<compile_context>
chip_gen: v7x
topology: tpu7x:2x2x1
jax: 0.10.0
libtpu: 0.0.40
codegen_flags: <defaults>
</compile_context>

<pallas_src>
import jax
import jax.numpy as jnp
from jax import lax
from jax.experimental import pallas as pl
from jax.experimental.pallas import tpu as pltpu


# ----------------------------- kernel --------------------------------------
def autoencoder_kernel(
    x_ref,
    w1, b1, w2, b2, w3, b3, w4, b4,   # encoder linears (BN folded into w4/b4)
    w5, b5, w6, b6, w7, b7, w8, b8,   # decoder linears
    out_ref,
):
    cdt = w1.dtype  # matmul operand dtype (bf16 or f32); accumulation is f32

    def lin(h, w_ref, b_ref):
        return jnp.dot(h.astype(cdt), w_ref[...],
                       preferred_element_type=jnp.float32) + b_ref[...]

    h = x_ref[...]
    # encode: (Linear + ReLU + Dropout(id)) x3, then Linear
    h = jnp.maximum(lin(h, w1, b1), 0.0)
    h = jnp.maximum(lin(h, w2, b2), 0.0)
    h = jnp.maximum(lin(h, w3, b3), 0.0)
    h = lin(h, w4, b4)                 # eval-mode BatchNorm folded in here
    # decode: (Linear + ReLU + Dropout(id)) x3, then Linear
    h = jnp.maximum(lin(h, w5, b5), 0.0)
    h = jnp.maximum(lin(h, w6, b6), 0.0)
    h = jnp.maximum(lin(h, w7, b7), 0.0)
    out_ref[...] = lin(h, w8, b8)


# --------------------------- wrapper / prep ---------------------------------
def _round_up(n, m):
    return (n + m - 1) // m * m


def _pad_to(a, shape):
    return jnp.zeros(shape, a.dtype).at[: a.shape[0], : a.shape[1]].set(a)


def prepare_params(params, in_shape, enc_shape, compute_dtype=jnp.bfloat16):
    """Fold eval-mode BN into w4/b4, zero-pad lane-sparse dims to 128, cast weights."""
    (w1, b1, w2, b2, w3, b3, w4, b4,
     gamma, beta, rmean, rvar,
     w5, b5, w6, b6, w7, b7, w8, b8) = params

    eps = 1e-5
    s = gamma * lax.rsqrt(rvar + eps)          # (1, enc)
    w4f = w4 * s                               # column scale
    b4f = (b4 - rmean) * s + beta

    f_pad = _round_up(in_shape, 128)
    e_pad = _round_up(enc_shape, 128)

    w1p = _pad_to(w1, (f_pad, 512))
    w4p = _pad_to(w4f, (64, e_pad))
    b4p = _pad_to(b4f, (1, e_pad))
    w5p = _pad_to(w5, (e_pad, 64))
    w8p = _pad_to(w8, (512, f_pad))
    b8p = _pad_to(b8, (1, f_pad))

    ws = [w1p, w2, w3, w4p, w5p, w6, w7, w8p]
    bs = [b1, b2, b3, b4p, b5, b6, b7, b8p]
    flat = []
    for w, b in zip(ws, bs):
        flat.append(w.astype(compute_dtype))   # MXU operand dtype
        flat.append(b.astype(jnp.float32))     # biases added in f32
    return tuple(flat), f_pad, e_pad


def autoencoder_forward(x, params, *, compute_dtype=jnp.bfloat16, tile_b=256):
    B, in_shape = x.shape
    enc_shape = params[8].shape[-1]            # gamma width

    kparams, f_pad, e_pad = prepare_params(params, in_shape, enc_shape, compute_dtype)

    # Batch tiling: fill MXU rows (256) when the batch allows it; keep sublane-aligned.
    TILE_B = min(tile_b, _round_up(B, 8))
    B_pad = _round_up(B, TILE_B)
    xp = jnp.zeros((B_pad, f_pad), jnp.float32).at[:B, :in_shape].set(x)

    grid = (B_pad // TILE_B,)

    in_specs = [pl.BlockSpec((TILE_B, f_pad), lambda i: (i, 0))]
    for p in kparams:
        # Full-array blocks, constant index map -> VMEM-resident across iterations.
        in_specs.append(pl.BlockSpec(p.shape, lambda i: (0, 0)))
    out_specs = pl.BlockSpec((TILE_B, f_pad), lambda i: (i, 0))

    dims = [f_pad, 512, 128, 64, e_pad, 64, 128, 512, f_pad]
    flops = 2 * B_pad * sum(a * b for a, b in zip(dims[:-1], dims[1:]))
    bytes_accessed = (sum(int(p.size) * p.dtype.itemsize for p in kparams)
                      + 2 * int(xp.size) * 4)

    out = pl.pallas_call(
        autoencoder_kernel,
        out_shape=jax.ShapeDtypeStruct((B_pad, f_pad), jnp.float32),
        grid=grid,
        in_specs=in_specs,
        out_specs=out_specs,
        compiler_params=pltpu.CompilerParams(
            dimension_semantics=("parallel",),
            vmem_limit_bytes=32 * 1024 * 1024,
        ),
        cost_estimate=pl.CostEstimate(
            flops=flops, transcendentals=0, bytes_accessed=bytes_accessed),
    )(xp, *kparams)

    return out[:B, :in_shape]


# --------------------------- params / reference -----------------------------
def init_params(key, in_shape, enc_shape):
    layer_dims = [
        (in_shape, 512), (512, 128), (128, 64), (64, enc_shape),   # encode
        (enc_shape, 64), (64, 128), (128, 512), (512, in_shape),   # decode
    ]
    keys = jax.random.split(key, 2 * len(layer_dims) + 2)
    ws, bs = [], []
    for i, (din, dout) in enumerate(layer_dims):
        bound = 1.0 / jnp.sqrt(din)
        w = jax.random.uniform(keys[2 * i], (din, dout), jnp.float32, -bound, bound)
        b = jax.random.uniform(keys[2 * i + 1], (1, dout), jnp.float32, -bound, bound)
        ws.append(w)
        bs.append(b)
    gamma = 1.0 + 0.1 * jax.random.normal(keys[-2], (1, enc_shape), jnp.float32)
    beta = 0.1 * jax.random.normal(keys[-1], (1, enc_shape), jnp.float32)
    rmean = 0.05 * jnp.ones((1, enc_shape), jnp.float32)
    rvar = jnp.ones((1, enc_shape), jnp.float32)
    return (
        ws[0], bs[0], ws[1], bs[1], ws[2], bs[2], ws[3], bs[3],
        gamma, beta, rmean, rvar,
        ws[4], bs[4], ws[5], bs[5], ws[6], bs[6], ws[7], bs[7],
    )


def reference_forward(x, params):
    (w1, b1, w2, b2, w3, b3, w4, b4,
     gamma, beta, rmean, rvar,
     w5, b5, w6, b6, w7, b7, w8, b8) = params
    dot = lambda a, b: jnp.dot(a, b, precision=lax.Precision.HIGHEST)
    h = jnp.maximum(dot(x, w1) + b1, 0.0)
    h = jnp.maximum(dot(h, w2) + b2, 0.0)
    h = jnp.maximum(dot(h, w3) + b3, 0.0)
    e = dot(h, w4) + b4
    h = (e - rmean) / jnp.sqrt(rvar + 1e-5) * gamma + beta
    h = jnp.maximum(dot(h, w5) + b5, 0.0)
    h = jnp.maximum(dot(h, w6) + b6, 0.0)
    h = jnp.maximum(dot(h, w7) + b7, 0.0)
    return dot(h, w8) + b8


# ------------------------------- main ---------------------------------------
if __name__ == "__main__":
    B, IN_SHAPE, ENC_SHAPE = 8, 32, 8

    key = jax.random.PRNGKey(0)
    k_x, k_p = jax.random.split(key)
    x = jax.random.normal(k_x, (B, IN_SHAPE), jnp.float32)
    params = init_params(k_p, IN_SHAPE, ENC_SHAPE)

    compute_dtype = jnp.bfloat16   # bf16 MXU operands, f32 accumulation
    out = autoencoder_forward(x, params, compute_dtype=compute_dtype)
    out = jax.block_until_ready(out)

    ref = reference_forward(x, params)
    assert out.shape == (B, IN_SHAPE)
    if compute_dtype == jnp.float32:
        atol = rtol = 1e-4
    else:
        atol = rtol = 5e-2   # bf16 weight quantization over 512-wide contractions
    assert jnp.allclose(out, ref, atol=atol, rtol=rtol), "mismatch vs reference"

    print("KERNEL_OK")
</pallas_src>

<mosaic_0001>
module attributes {stable_mosaic.version = 11 : i64} {
  func.func @autoencoder_kernel(%arg0: i32, %arg1: memref<8x128xf32, #tpu.memory_space<vmem>>, %arg2: memref<128x512xbf16, #tpu.memory_space<vmem>>, %arg3: memref<1x512xf32, #tpu.memory_space<vmem>>, %arg4: memref<512x128xbf16, #tpu.memory_space<vmem>>, %arg5: memref<1x128xf32, #tpu.memory_space<vmem>>, %arg6: memref<128x64xbf16, #tpu.memory_space<vmem>>, %arg7: memref<1x64xf32, #tpu.memory_space<vmem>>, %arg8: memref<64x128xbf16, #tpu.memory_space<vmem>>, %arg9: memref<1x128xf32, #tpu.memory_space<vmem>>, %arg10: memref<128x64xbf16, #tpu.memory_space<vmem>>, %arg11: memref<1x64xf32, #tpu.memory_space<vmem>>, %arg12: memref<64x128xbf16, #tpu.memory_space<vmem>>, %arg13: memref<1x128xf32, #tpu.memory_space<vmem>>, %arg14: memref<128x512xbf16, #tpu.memory_space<vmem>>, %arg15: memref<1x512xf32, #tpu.memory_space<vmem>>, %arg16: memref<512x128xbf16, #tpu.memory_space<vmem>>, %arg17: memref<1x128xf32, #tpu.memory_space<vmem>>, %arg18: memref<8x128xf32, #tpu.memory_space<vmem>>) attributes {dimension_semantics = [#tpu.dimension_semantics<parallel>], iteration_bounds = array<i64: 1>, scalar_prefetch = 0 : i64, scratch_operands = 0 : i64, tpu.core_type = #tpu.core_type<tc>, window_params = [{transform_indices = @transform_0, window_bounds = array<i64: 8, 128>}, {pipeline_mode = #tpu.pipeline_mode<synchronous>, transform_indices = @transform_1, window_bounds = array<i64: 128, 512>}, {pipeline_mode = #tpu.pipeline_mode<synchronous>, transform_indices = @transform_2, window_bounds = array<i64: 1, 512>}, {pipeline_mode = #tpu.pipeline_mode<synchronous>, transform_indices = @transform_3, window_bounds = array<i64: 512, 128>}, {pipeline_mode = #tpu.pipeline_mode<synchronous>, transform_indices = @transform_4, window_bounds = array<i64: 1, 128>}, {pipeline_mode = #tpu.pipeline_mode<synchronous>, transform_indices = @transform_5, window_bounds = array<i64: 128, 64>}, {pipeline_mode = #tpu.pipeline_mode<synchronous>, transform_indices = @transform_6, window_bounds = array<i64: 1, 64>}, {pipeline_mode = #tpu.pipeline_mode<synchronous>, transform_indices = @transform_7, window_bounds = array<i64: 64, 128>}, {pipeline_mode = #tpu.pipeline_mode<synchronous>, transform_indices = @transform_8, window_bounds = array<i64: 1, 128>}, {pipeline_mode = #tpu.pipeline_mode<synchronous>, transform_indices = @transform_9, window_bounds = array<i64: 128, 64>}, {pipeline_mode = #tpu.pipeline_mode<synchronous>, transform_indices = @transform_10, window_bounds = array<i64: 1, 64>}, {pipeline_mode = #tpu.pipeline_mode<synchronous>, transform_indices = @transform_11, window_bounds = array<i64: 64, 128>}, {pipeline_mode = #tpu.pipeline_mode<synchronous>, transform_indices = @transform_12, window_bounds = array<i64: 1, 128>}, {pipeline_mode = #tpu.pipeline_mode<synchronous>, transform_indices = @transform_13, window_bounds = array<i64: 128, 512>}, {pipeline_mode = #tpu.pipeline_mode<synchronous>, transform_indices = @transform_14, window_bounds = array<i64: 1, 512>}, {pipeline_mode = #tpu.pipeline_mode<synchronous>, transform_indices = @transform_15, window_bounds = array<i64: 512, 128>}, {pipeline_mode = #tpu.pipeline_mode<synchronous>, transform_indices = @transform_16, window_bounds = array<i64: 1, 128>}, {transform_indices = @transform_17, window_bounds = array<i64: 8, 128>}]} {
    %c0 = arith.constant 0 : index
    %c0_0 = arith.constant 0 : index
    %0 = vector.load %arg1[%c0, %c0_0] : memref<8x128xf32, #tpu.memory_space<vmem>>, vector<8x128xf32>
    %1 = arith.truncf %0 : vector<8x128xf32> to vector<8x128xbf16>
    %c0_1 = arith.constant 0 : index
    %c0_2 = arith.constant 0 : index
    %2 = vector.load %arg2[%c0_1, %c0_2] : memref<128x512xbf16, #tpu.memory_space<vmem>>, vector<128x512xbf16>
    %cst = arith.constant dense<0.000000e+00> : vector<8x512xf32>
    %3 = tpu.matmul %1, %2, %cst {dimension_numbers = #tpu.dot_dimension_numbers<[1], [0], [0], [1], [0, 0, 1, 1], [], []>} : vector<8x128xbf16>, vector<128x512xbf16>, vector<8x512xf32> -> vector<8x512xf32>
    %c0_3 = arith.constant 0 : index
    %c0_4 = arith.constant 0 : index
    %4 = vector.load %arg3[%c0_3, %c0_4] : memref<1x512xf32, #tpu.memory_space<vmem>>, vector<1x512xf32>
    %5 = vector.broadcast %4 : vector<1x512xf32> to vector<8x512xf32>
    %6 = arith.addf %3, %5 : vector<8x512xf32>
    %cst_5 = arith.constant 0.000000e+00 : f32
    %7 = vector.broadcast %cst_5 : f32 to vector<8x512xf32>
    %8 = arith.maximumf %6, %7 : vector<8x512xf32>
    %9 = arith.truncf %8 : vector<8x512xf32> to vector<8x512xbf16>
    %c0_6 = arith.constant 0 : index
    %c0_7 = arith.constant 0 : index
    %10 = vector.load %arg4[%c0_6, %c0_7] : memref<512x128xbf16, #tpu.memory_space<vmem>>, vector<512x128xbf16>
    %cst_8 = arith.constant dense<0.000000e+00> : vector<8x128xf32>
    %11 = tpu.matmul %9, %10, %cst_8 {dimension_numbers = #tpu.dot_dimension_numbers<[1], [0], [0], [1], [0, 0, 1, 1], [], []>} : vector<8x512xbf16>, vector<512x128xbf16>, vector<8x128xf32> -> vector<8x128xf32>
    %c0_9 = arith.constant 0 : index
    %c0_10 = arith.constant 0 : index
    %12 = vector.load %arg5[%c0_9, %c0_10] : memref<1x128xf32, #tpu.memory_space<vmem>>, vector<1x128xf32>
    %13 = vector.broadcast %12 : vector<1x128xf32> to vector<8x128xf32>
    %14 = arith.addf %11, %13 : vector<8x128xf32>
    %cst_11 = arith.constant 0.000000e+00 : f32
    %15 = vector.broadcast %cst_11 : f32 to vector<8x128xf32>
    %16 = arith.maximumf %14, %15 : vector<8x128xf32>
    %17 = arith.truncf %16 : vector<8x128xf32> to vector<8x128xbf16>
    %c0_12 = arith.constant 0 : index
    %c0_13 = arith.constant 0 : index
    %18 = vector.load %arg6[%c0_12, %c0_13] : memref<128x64xbf16, #tpu.memory_space<vmem>>, vector<128x64xbf16>
    %cst_14 = arith.constant dense<0.000000e+00> : vector<8x64xf32>
    %19 = tpu.matmul %17, %18, %cst_14 {dimension_numbers = #tpu.dot_dimension_numbers<[1], [0], [0], [1], [0, 0, 1, 1], [], []>} : vector<8x128xbf16>, vector<128x64xbf16>, vector<8x64xf32> -> vector<8x64xf32>
    %c0_15 = arith.constant 0 : index
    %c0_16 = arith.constant 0 : index
    %20 = vector.load %arg7[%c0_15, %c0_16] : memref<1x64xf32, #tpu.memory_space<vmem>>, vector<1x64xf32>
    %21 = vector.broadcast %20 : vector<1x64xf32> to vector<8x64xf32>
    %22 = arith.addf %19, %21 : vector<8x64xf32>
    %cst_17 = arith.constant 0.000000e+00 : f32
    %23 = vector.broadcast %cst_17 : f32 to vector<8x64xf32>
    %24 = arith.maximumf %22, %23 : vector<8x64xf32>
    %25 = arith.truncf %24 : vector<8x64xf32> to vector<8x64xbf16>
    %c0_18 = arith.constant 0 : index
    %c0_19 = arith.constant 0 : index
    %26 = vector.load %arg8[%c0_18, %c0_19] : memref<64x128xbf16, #tpu.memory_space<vmem>>, vector<64x128xbf16>
    %cst_20 = arith.constant dense<0.000000e+00> : vector<8x128xf32>
    %27 = tpu.matmul %25, %26, %cst_20 {dimension_numbers = #tpu.dot_dimension_numbers<[1], [0], [0], [1], [0, 0, 1, 1], [], []>} : vector<8x64xbf16>, vector<64x128xbf16>, vector<8x128xf32> -> vector<8x128xf32>
    %c0_21 = arith.constant 0 : index
    %c0_22 = arith.constant 0 : index
    %28 = vector.load %arg9[%c0_21, %c0_22] : memref<1x128xf32, #tpu.memory_space<vmem>>, vector<1x128xf32>
    %29 = vector.broadcast %28 : vector<1x128xf32> to vector<8x128xf32>
    %30 = arith.addf %27, %29 : vector<8x128xf32>
    %31 = arith.truncf %30 : vector<8x128xf32> to vector<8x128xbf16>
    %c0_23 = arith.constant 0 : index
    %c0_24 = arith.constant 0 : index
    %32 = vector.load %arg10[%c0_23, %c0_24] : memref<128x64xbf16, #tpu.memory_space<vmem>>, vector<128x64xbf16>
    %cst_25 = arith.constant dense<0.000000e+00> : vector<8x64xf32>
    %33 = tpu.matmul %31, %32, %cst_25 {dimension_numbers = #tpu.dot_dimension_numbers<[1], [0], [0], [1], [0, 0, 1, 1], [], []>} : vector<8x128xbf16>, vector<128x64xbf16>, vector<8x64xf32> -> vector<8x64xf32>
    %c0_26 = arith.constant 0 : index
    %c0_27 = arith.constant 0 : index
    %34 = vector.load %arg11[%c0_26, %c0_27] : memref<1x64xf32, #tpu.memory_space<vmem>>, vector<1x64xf32>
    %35 = vector.broadcast %34 : vector<1x64xf32> to vector<8x64xf32>
    %36 = arith.addf %33, %35 : vector<8x64xf32>
    %cst_28 = arith.constant 0.000000e+00 : f32
    %37 = vector.broadcast %cst_28 : f32 to vector<8x64xf32>
    %38 = arith.maximumf %36, %37 : vector<8x64xf32>
    %39 = arith.truncf %38 : vector<8x64xf32> to vector<8x64xbf16>
    %c0_29 = arith.constant 0 : index
    %c0_30 = arith.constant 0 : index
    %40 = vector.load %arg12[%c0_29, %c0_30] : memref<64x128xbf16, #tpu.memory_space<vmem>>, vector<64x128xbf16>
    %cst_31 = arith.constant dense<0.000000e+00> : vector<8x128xf32>
    %41 = tpu.matmul %39, %40, %cst_31 {dimension_numbers = #tpu.dot_dimension_numbers<[1], [0], [0], [1], [0, 0, 1, 1], [], []>} : vector<8x64xbf16>, vector<64x128xbf16>, vector<8x128xf32> -> vector<8x128xf32>
    %c0_32 = arith.constant 0 : index
    %c0_33 = arith.constant 0 : index
    %42 = vector.load %arg13[%c0_32, %c0_33] : memref<1x128xf32, #tpu.memory_space<vmem>>, vector<1x128xf32>
    %43 = vector.broadcast %42 : vector<1x128xf32> to vector<8x128xf32>
    %44 = arith.addf %41, %43 : vector<8x128xf32>
    %cst_34 = arith.constant 0.000000e+00 : f32
    %45 = vector.broadcast %cst_34 : f32 to vector<8x128xf32>
    %46 = arith.maximumf %44, %45 : vector<8x128xf32>
    %47 = arith.truncf %46 : vector<8x128xf32> to vector<8x128xbf16>
    %c0_35 = arith.constant 0 : index
    %c0_36 = arith.constant 0 : index
    %48 = vector.load %arg14[%c0_35, %c0_36] : memref<128x512xbf16, #tpu.memory_space<vmem>>, vector<128x512xbf16>
    %cst_37 = arith.constant dense<0.000000e+00> : vector<8x512xf32>
    %49 = tpu.matmul %47, %48, %cst_37 {dimension_numbers = #tpu.dot_dimension_numbers<[1], [0], [0], [1], [0, 0, 1, 1], [], []>} : vector<8x128xbf16>, vector<128x512xbf16>, vector<8x512xf32> -> vector<8x512xf32>
    %c0_38 = arith.constant 0 : index
    %c0_39 = arith.constant 0 : index
    %50 = vector.load %arg15[%c0_38, %c0_39] : memref<1x512xf32, #tpu.memory_space<vmem>>, vector<1x512xf32>
    %51 = vector.broadcast %50 : vector<1x512xf32> to vector<8x512xf32>
    %52 = arith.addf %49, %51 : vector<8x512xf32>
    %cst_40 = arith.constant 0.000000e+00 : f32
    %53 = vector.broadcast %cst_40 : f32 to vector<8x512xf32>
    %54 = arith.maximumf %52, %53 : vector<8x512xf32>
    %55 = arith.truncf %54 : vector<8x512xf32> to vector<8x512xbf16>
    %c0_41 = arith.constant 0 : index
    %c0_42 = arith.constant 0 : index
    %56 = vector.load %arg16[%c0_41, %c0_42] : memref<512x128xbf16, #tpu.memory_space<vmem>>, vector<512x128xbf16>
    %cst_43 = arith.constant dense<0.000000e+00> : vector<8x128xf32>
    %57 = tpu.matmul %55, %56, %cst_43 {dimension_numbers = #tpu.dot_dimension_numbers<[1], [0], [0], [1], [0, 0, 1, 1], [], []>} : vector<8x512xbf16>, vector<512x128xbf16>, vector<8x128xf32> -> vector<8x128xf32>
    %c0_44 = arith.constant 0 : index
    %c0_45 = arith.constant 0 : index
    %58 = vector.load %arg17[%c0_44, %c0_45] : memref<1x128xf32, #tpu.memory_space<vmem>>, vector<1x128xf32>
    %59 = vector.broadcast %58 : vector<1x128xf32> to vector<8x128xf32>
    %60 = arith.addf %57, %59 : vector<8x128xf32>
    %c0_46 = arith.constant 0 : index
    %c0_47 = arith.constant 0 : index
    %61 = vector.load %arg18[%c0_46, %c0_47] : memref<8x128xf32, #tpu.memory_space<vmem>>, vector<8x128xf32>
    tpu.vector_store %arg18[%c0_46, %c0_47], %60 {strides = array<i32>} : memref<8x128xf32, #tpu.memory_space<vmem>>, vector<8x128xf32>,
    return
  }
  func.func @transform_0(%arg0: i32) -> (i32, i32) {
    %c0_i32 = arith.constant 0 : i32
    %c0_i32_0 = arith.constant 0 : i32
    return %arg0, %c0_i32 : i32, i32
  }
  func.func @transform_1(%arg0: i32) -> (i32, i32) {
    %c0_i32 = arith.constant 0 : i32
    %c0_i32_0 = arith.constant 0 : i32
    %c0_i32_1 = arith.constant 0 : i32
    return %c0_i32, %c0_i32_0 : i32, i32
  }
  func.func @transform_2(%arg0: i32) -> (i32, i32) {
    %c0_i32 = arith.constant 0 : i32
    %c0_i32_0 = arith.constant 0 : i32
    %c0_i32_1 = arith.constant 0 : i32
    return %c0_i32, %c0_i32_0 : i32, i32
  }
  func.func @transform_3(%arg0: i32) -> (i32, i32) {
    %c0_i32 = arith.constant 0 : i32
    %c0_i32_0 = arith.constant 0 : i32
    %c0_i32_1 = arith.constant 0 : i32
    return %c0_i32, %c0_i32_0 : i32, i32
  }
  func.func @transform_4(%arg0: i32) -> (i32, i32) {
    %c0_i32 = arith.constant 0 : i32
    %c0_i32_0 = arith.constant 0 : i32
    %c0_i32_1 = arith.constant 0 : i32
    return %c0_i32, %c0_i32_0 : i32, i32
  }
  func.func @transform_5(%arg0: i32) -> (i32, i32) {
    %c0_i32 = arith.constant 0 : i32
    %c0_i32_0 = arith.constant 0 : i32
    %c0_i32_1 = arith.constant 0 : i32
    return %c0_i32, %c0_i32_0 : i32, i32
  }
  func.func @transform_6(%arg0: i32) -> (i32, i32) {
    %c0_i32 = arith.constant 0 : i32
    %c0_i32_0 = arith.constant 0 : i32
    %c0_i32_1 = arith.constant 0 : i32
    return %c0_i32, %c0_i32_0 : i32, i32
  }
  func.func @transform_7(%arg0: i32) -> (i32, i32) {
    %c0_i32 = arith.constant 0 : i32
    %c0_i32_0 = arith.constant 0 : i32
    %c0_i32_1 = arith.constant 0 : i32
    return %c0_i32, %c0_i32_0 : i32, i32
  }
  func.func @transform_8(%arg0: i32) -> (i32, i32) {
    %c0_i32 = arith.constant 0 : i32
    %c0_i32_0 = arith.constant 0 : i32
    %c0_i32_1 = arith.constant 0 : i32
    return %c0_i32, %c0_i32_0 : i32, i32
  }
  func.func @transform_9(%arg0: i32) -> (i32, i32) {
    %c0_i32 = arith.constant 0 : i32
    %c0_i32_0 = arith.constant 0 : i32
    %c0_i32_1 = arith.constant 0 : i32
    return %c0_i32, %c0_i32_0 : i32, i32
  }
  func.func @transform_10(%arg0: i32) -> (i32, i32) {
    %c0_i32 = arith.constant 0 : i32
    %c0_i32_0 = arith.constant 0 : i32
    %c0_i32_1 = arith.constant 0 : i32
    return %c0_i32, %c0_i32_0 : i32, i32
  }
  func.func @transform_11(%arg0: i32) -> (i32, i32) {
    %c0_i32 = arith.constant 0 : i32
    %c0_i32_0 = arith.constant 0 : i32
    %c0_i32_1 = arith.constant 0 : i32
    return %c0_i32, %c0_i32_0 : i32, i32
  }
  func.func @transform_12(%arg0: i32) -> (i32, i32) {
    %c0_i32 = arith.constant 0 : i32
    %c0_i32_0 = arith.constant 0 : i32
    %c0_i32_1 = arith.constant 0 : i32
    return %c0_i32, %c0_i32_0 : i32, i32
  }
  func.func @transform_13(%arg0: i32) -> (i32, i32) {
    %c0_i32 = arith.constant 0 : i32
    %c0_i32_0 = arith.constant 0 : i32
    %c0_i32_1 = arith.constant 0 : i32
    return %c0_i32, %c0_i32_0 : i32, i32
  }
  func.func @transform_14(%arg0: i32) -> (i32, i32) {
    %c0_i32 = arith.constant 0 : i32
    %c0_i32_0 = arith.constant 0 : i32
    %c0_i32_1 = arith.constant 0 : i32
    return %c0_i32, %c0_i32_0 : i32, i32
  }
  func.func @transform_15(%arg0: i32) -> (i32, i32) {
    %c0_i32 = arith.constant 0 : i32
    %c0_i32_0 = arith.constant 0 : i32
    %c0_i32_1 = arith.constant 0 : i32
    return %c0_i32, %c0_i32_0 : i32, i32
  }
  func.func @transform_16(%arg0: i32) -> (i32, i32) {
    %c0_i32 = arith.constant 0 : i32
    %c0_i32_0 = arith.constant 0 : i32
    %c0_i32_1 = arith.constant 0 : i32
    return %c0_i32, %c0_i32_0 : i32, i32
  }
  func.func @transform_17(%arg0: i32) -> (i32, i32) {
    %c0_i32 = arith.constant 0 : i32
    %c0_i32_0 = arith.constant 0 : i32
    return %arg0, %c0_i32 : i32, i32
  }
}

</mosaic_0001>

<bundles_post_ra>
// kernel: tpu_custom_call.1
= control target key start
LH: loop header
LB: loop body
LE: loop exit
PB: predicated region body
PF: predicated region fallthrough
CT: control target
= control target key end

     0   :  { %s2811_s0 = inlined_call_operand.vmem [shape: f32[8,128], index: 0, kind: input, shape index: {}]   ;;  %s2812_s1 = inlined_call_operand.hbm [shape: bf16[128,512], index: 1, kind: input, shape index: {}]   ;;  %s2813_s2 = inlined_call_operand.vmem [shape: f32[1,512], index: 2, kind: input, shape index: {}]   ;;  %s2814_s3 = inlined_call_operand.hbm [shape: bf16[512,128], index: 3, kind: input, shape index: {}]   ;;  %s2815_s4 = inlined_call_operand.vmem [shape: f32[1,128], index: 4, kind: input, shape index: {}]   ;;  %s2816_s5 = inlined_call_operand.vmem [shape: bf16[128,64], index: 5, kind: input, shape index: {}]   ;;  %s2817_s6 = inlined_call_operand.vmem [shape: f32[1,64], index: 6, kind: input, shape index: {}]   ;;  %s2818_s7 = inlined_call_operand.vmem [shape: bf16[64,128], index: 7, kind: input, shape index: {}]   ;;  %s2819_s8 = inlined_call_operand.vmem [shape: f32[1,128], index: 8, kind: input, shape index: {}]   ;;  %s2820_s9 = inlined_call_operand.vmem [shape: bf16[128,64], index: 9, kind: input, shape index: {}]   ;;  %s2821_s10 = inlined_call_operand.vmem [shape: f32[1,64], index: 10, kind: input, shape index: {}]   ;;  %s2822_s11 = inlined_call_operand.vmem [shape: bf16[64,128], index: 11, kind: input, shape index: {}]   ;;  %s2823_s12 = inlined_call_operand.vmem [shape: f32[1,128], index: 12, kind: input, shape index: {}]   ;;  %s2824_s13 = inlined_call_operand.hbm [shape: bf16[128,512], index: 13, kind: input, shape index: {}]   ;;  %s2825_s14 = inlined_call_operand.vmem [shape: f32[1,512], index: 14, kind: input, shape index: {}]   ;;  %s2826_s15 = inlined_call_operand.hbm [shape: bf16[512,128], index: 15, kind: input, shape index: {}]   ;;  %s2827_s16 = inlined_call_operand.vmem [shape: f32[1,128], index: 16, kind: input, shape index: {}]   ;;  %s2828_s17 = inlined_call_operand.hbm [shape: f32[8,128], index: 17, kind: output, shape index: {}]  }
   0x1   :  { %2833 = sst [smem:[#allocation15_spill]] %s2811_s0 }
   0x2   :  { %2834 = sst [smem:[#allocation16_spill]] %s2812_s1 }
   0x3   :  { %2835 = sst [smem:[#allocation17_spill]] %s2828_s17 }
   0x4   :  { %22 = vsyncpa [#allocation3], 0 }
   0x5   :  { %23 = vsyncpa [#allocation6], 0 }
   0x6   :  { %24 = vsyncpa [#allocation9], 0 }
   0x7   :  { %25 = vsyncpa [#allocation4], 0  ;;  %s2477_s24 = smov [#allocation5]   ;;  %s2359_s28 = scalar_lea.hbm %s2814_s3, 4096 }
   0x8   :  { %s47_s25 = sshll.u32 %s2477_s24, 4  ;;  %p2360_p0 = scmp.ne.s32.totalorder %s2814_s3, %s2359_s28  ;;  %s48_s25 = int_to_ptr.vmem [resolvable:$true] %s47_s25 }
   0x9   :  { %p2363_p1 = scmp.lt.u32.totalorder %s2359_s28, %s2814_s3 }
   0xb   :  { %p2365_p2 = pnand %p2363_p1, %p2360_p0 }
   0xd   :  { %2368 = shalt.err (!%p2365_p2)
}
   0xe   :  { %s2369_s19 = scalar_lea.vmem %s48_s25, 4096  ;;  %p2374_p4 = scmp.lt.s32.totalorder %s48_s25, %s48_s25 }
   0xf   :  { %p2370_p3 = scmp.ne.s32.totalorder %s48_s25, %s2369_s19  ;;  %p2375_p5 = scmp.lt.s32.totalorder %s2369_s19, %s2369_s19 }
  0x11   :  { %p2376_p6 = por %p2375_p5, %p2374_p4 }
  0x13   :  { %p2377_p7 = pnand %p2376_p6, %p2370_p3 }
  0x15   :  { %2380 = shalt.err (!%p2377_p7)
}
  0x16   :  { %s2831_s1 = smov 64   ;;  %s2832_s20 = smov 4  }
  0x17   :  { %53 = dma.hbm_to_vmem [thread:$0]  %s2814_s3, 4096, %s48_s25, [#allocation6], %s2831_s1, %s2831_s1, %s2832_s20  }
  0x18   :  { %s2480_s23 = smov [#allocation2]   ;;  %s2836_s28 = sld [smem:[#allocation16_spill]] }
  0x19   :  { %s33_s24 = sshll.u32 %s2480_s23, 4  ;;  %s34_s24 = int_to_ptr.vmem [resolvable:$true] %s33_s24 }
  0x1e   :  { %s2381_s29 = scalar_lea.hbm %s2836_s28, 4096 }
  0x1f   :  { %p2382_p8 = scmp.ne.s32.totalorder %s2836_s28, %s2381_s29  ;;  %p2385_p9 = scmp.lt.u32.totalorder %s2381_s29, %s2836_s28 }
  0x21   :  { %p2387_p10 = pnand %p2385_p9, %p2382_p8 }
  0x23   :  { %2390 = shalt.err (!%p2387_p10)
}
  0x24   :  { %s2391_s17 = scalar_lea.vmem %s34_s24, 4096  ;;  %p2396_p12 = scmp.lt.s32.totalorder %s34_s24, %s34_s24 }
  0x25   :  { %p2392_p11 = scmp.ne.s32.totalorder %s34_s24, %s2391_s17  ;;  %p2397_p13 = scmp.lt.s32.totalorder %s2391_s17, %s2391_s17 }
  0x27   :  { %p2398_p0 = por %p2397_p13, %p2396_p12 }
  0x29   :  { %p2399_p1 = pnand %p2398_p0, %p2392_p11 }
  0x2b   :  { %2402 = shalt.err (!%p2399_p1)
}
  0x2c   :  { %s2481_s3 = smov 256   ;;  %s2482_s25 = smov 16  }
  0x2d   :  { %39 = dma.hbm_to_vmem [thread:$0]  %s2836_s28, 4096, %s34_s24, [#allocation3], %s2481_s3, %s2481_s3, %s2482_s25  }
  0x2e   :  { %s2483_s23 = smov [#allocation7]   ;;  %s2484_s27 = smov [#allocation8]  }
  0x2f   :  { %s77_s26 = sshll.u32 %s2483_s23, 4  ;;  %s91_s0 = sshll.u32 %s2484_s27, 4  ;;  %s78_s26 = int_to_ptr.vmem [resolvable:$true] %s77_s26  ;;  %s2606_s0 = int_to_ptr.vmem [resolvable:$true] %s91_s0 }
  0x30   :  { %s2403_s17 = scalar_lea.hbm %s2824_s13, 4096 }
  0x31   :  { %p2404_p2 = scmp.ne.s32.totalorder %s2824_s13, %s2403_s17  ;;  %p2407_p3 = scmp.lt.u32.totalorder %s2403_s17, %s2824_s13 }
  0x33   :  { %p2409_p4 = pnand %p2407_p3, %p2404_p2 }
  0x35   :  { %2412 = shalt.err (!%p2409_p4)
}
  0x36   :  { %s2413_s24 = scalar_lea.vmem %s78_s26, 4096  ;;  %p2418_p6 = scmp.lt.s32.totalorder %s78_s26, %s78_s26 }
  0x37   :  { %p2414_p5 = scmp.ne.s32.totalorder %s78_s26, %s2413_s24  ;;  %p2419_p7 = scmp.lt.s32.totalorder %s2413_s24, %s2413_s24 }
  0x39   :  { %p2420_p8 = por %p2419_p7, %p2418_p6 }
  0x3b   :  { %p2421_p9 = pnand %p2420_p8, %p2414_p5 }
  0x3d   :  { %2424 = shalt.err (!%p2421_p9)
}
  0x3e   :  { %83 = dma.hbm_to_vmem [thread:$0]  %s2824_s13, 4096, %s78_s26, [#allocation6], %s2481_s3, %s2481_s3, %s2482_s25  }
  0x3f   :  { %s2425_s27 = scalar_lea.hbm %s2826_s15, 4096 }
  0x40   :  { %p2426_p10 = scmp.ne.s32.totalorder %s2826_s15, %s2425_s27  ;;  %p2429_p11 = scmp.lt.u32.totalorder %s2425_s27, %s2826_s15 }
  0x42   :  { %p2431_p12 = pnand %p2429_p11, %p2426_p10 }
  0x44   :  { %2434 = shalt.err (!%p2431_p12)
}
  0x45   :  { %s2435_s17 = scalar_lea.vmem %s2606_s0, 4096  ;;  %p2440_p0 = scmp.lt.s32.totalorder %s2606_s0, %s2606_s0 }
  0x46   :  { %p2436_p13 = scmp.ne.s32.totalorder %s2606_s0, %s2435_s17  ;;  %p2441_p1 = scmp.lt.s32.totalorder %s2435_s17, %s2435_s17 }
  0x48   :  { %p2442_p2 = por %p2441_p1, %p2440_p0 }
  0x4a   :  { %p2443_p3 = pnand %p2442_p2, %p2436_p13 }
  0x4c   :  { %2446 = shalt.err (!%p2443_p3)
}
  0x4d   :  { %s2837_s13 = smov 4   ;;  %s2838_s3 = smov 64  }
  0x4e   :  { %97 = dma.hbm_to_vmem [thread:$0]  %s2826_s15, 4096, %s2606_s0, [#allocation9], %s2838_s3, %s2838_s3, %s2837_s13  }
  0x4f   :  { %2469 = dma.done.wait [#allocation3], 4096  }
  0x50   :  { %2470 = vsyncadd [#allocation3], 4294963200 }
  0x51   :  { %2471 = dma.done.wait [#allocation6], 8192  }
  0x52   :  { %2472 = vsyncadd [#allocation6], 4294959104 }
  0x53   :  { %2473 = dma.done.wait [#allocation9], 4096  }
  0x54   :  { %2474 = vsyncadd [#allocation9], 4294963200  ;;  %v2485_v0 = vmov 0   ;;  %v2175_v1 = vld [vmem:[#allocation2 + $0x4] ss:$16 sps:$4 sm:$0xff]   ;;  %s2839_s18 = sld [smem:[#allocation15_spill]] }
  0x55   :  { %361 = vmatprep.mubr.bf16.mxu0 %v2485_v0  ;;  %402 = vmatprep.mubr.bf16.mxu1 %v2485_v0  ;;  %v2177_v2 = vld [vmem:[#allocation2 + $0xc] ss:$16 sps:$4 sm:$0xff]   ;;  %v2179_v3 = vld [vmem:[#allocation2] ss:$16 sps:$4 sm:$0xff]   ;;  %v2180_v4 = vld [vmem:[#allocation2 + $0x8] ss:$16 sps:$4 sm:$0xff]  }
  0x56   :  { %329 = vmatprep.subr.bf16.mxu0 %v2175_v1  ;;  %370 = vmatprep.subr.bf16.mxu1 %v2177_v2  ;;  %v2181_v5 = vld [vmem:[#allocation2 + $0x24] ss:$16 sps:$4 sm:$0xff]   ;;  %v2183_v6 = vld [vmem:[#allocation2 + $0x2c] ss:$16 sps:$4 sm:$0xff]   ;;  %v2185_v7 = vld [vmem:[#allocation2 + $0x20] ss:$16 sps:$4 sm:$0xff]  }
  0x57   :  { %330 = vmatpush1.bf16.msra.mxu0 %v2179_v3  ;;  %371 = vmatpush1.bf16.msra.mxu1 %v2180_v4  ;;  %v2186_v8 = vld [vmem:[#allocation2 + $0x28] ss:$16 sps:$4 sm:$0xff]   ;;  %v2187_v9 = vld [vmem:[#allocation2 + $0x44] ss:$16 sps:$4 sm:$0xff]   ;;  %v2189_v10 = vld [vmem:[#allocation2 + $0x4c] ss:$16 sps:$4 sm:$0xff]  }
  0x58   :  { %331 = vmatprep.subr.bf16.mxu0 %v2181_v5  ;;  %372 = vmatprep.subr.bf16.mxu1 %v2183_v6  ;;  %v2191_v11 = vld [vmem:[#allocation2 + $0x40] ss:$16 sps:$4 sm:$0xff]   ;;  %v2192_v12 = vld [vmem:[#allocation2 + $0x48] ss:$16 sps:$4 sm:$0xff]   ;;  %v2193_v13 = vld [vmem:[#allocation2 + $0x64] ss:$16 sps:$4 sm:$0xff]   ;;  %v149_v5 = vlaneseq }
  0x59   :  { %v2195_v14 = vld [vmem:[#allocation2 + $0x6c] ss:$16 sps:$4 sm:$0xff]   ;;  %v2197_v15 = vld [vmem:[#allocation2 + $0x60] ss:$16 sps:$4 sm:$0xff]   ;;  %v2198_v16 = vld [vmem:[#allocation2 + $0x68] ss:$16 sps:$4 sm:$0xff]  }
  0x5a   :  { %v2199_v17 = vld [vmem:[#allocation2 + $0x84] ss:$16 sps:$4 sm:$0xff]   ;;  %v2201_v18 = vld [vmem:[#allocation2 + $0x8c] ss:$16 sps:$4 sm:$0xff]   ;;  %v2203_v19 = vld [vmem:[#allocation2 + $0x80] ss:$16 sps:$4 sm:$0xff]  }
  0x5b   :  { %332 = vmatpush1.bf16.msra.mxu0 %v2185_v7  ;;  %373 = vmatpush1.bf16.msra.mxu1 %v2186_v8  ;;  %v2204_v20 = vld [vmem:[#allocation2 + $0x88] ss:$16 sps:$4 sm:$0xff]   ;;  %v2205_v21 = vld [vmem:[#allocation2 + $0xa4] ss:$16 sps:$4 sm:$0xff]   ;;  %v2207_v22 = vld [vmem:[#allocation2 + $0xac] ss:$16 sps:$4 sm:$0xff]  }
  0x5c   :  { %333 = vmatprep.subr.bf16.mxu0 %v2187_v9  ;;  %374 = vmatprep.subr.bf16.mxu1 %v2189_v10  ;;  %v2209_v23 = vld [vmem:[#allocation2 + $0xa0] ss:$16 sps:$4 sm:$0xff]   ;;  %v2210_v24 = vld [vmem:[#allocation2 + $0xa8] ss:$16 sps:$4 sm:$0xff]   ;;  %v2211_v25 = vld [vmem:[#allocation2 + $0xc4] ss:$16 sps:$4 sm:$0xff]  }
  0x5d   :  { %v2213_v26 = vld [vmem:[#allocation2 + $0xcc] ss:$16 sps:$4 sm:$0xff]   ;;  %v2215_v27 = vld [vmem:[#allocation2 + $0xc0] ss:$16 sps:$4 sm:$0xff]   ;;  %v2216_v28 = vld [vmem:[#allocation2 + $0xc8] ss:$16 sps:$4 sm:$0xff]  }
  0x5e   :  { %v2217_v29 = vld [vmem:[#allocation2 + $0xe4] ss:$16 sps:$4 sm:$0xff]   ;;  %v2219_v30 = vld [vmem:[#allocation2 + $0xec] ss:$16 sps:$4 sm:$0xff]   ;;  %v2221_v31 = vld [vmem:[#allocation2 + $0xe0] ss:$16 sps:$4 sm:$0xff]  }
  0x5f   :  { %334 = vmatpush1.bf16.msra.mxu0 %v2191_v11  ;;  %375 = vmatpush1.bf16.msra.mxu1 %v2192_v12  ;;  %v2222_v32 = vld [vmem:[#allocation2 + $0xe8] ss:$16 sps:$4 sm:$0xff]   ;;  %v113_v33 = vld [vmem:[%s2839_s18] sm:$0xff]  ;;  %v2231_v43 = vld [vmem:[#allocation5 + $0x50] sm:$0xff]   ;;  %v2486_v4 = vmov 0.0   ;;  %v2647_v6 = vshrl.u32 %v149_v5, 7 }
  0x60   :  { %335 = vmatprep.subr.bf16.mxu0 %v2193_v13  ;;  %376 = vmatprep.subr.bf16.mxu1 %v2195_v14  ;;  %v2223_v34 = vld [vmem:[#allocation5 + $0x40] sm:$0xff]   ;;  %v114_v37 = vpack.c.bf16 %v113_v33, %v113_v33  ;;  %v2227_v39 = vld [vmem:[#allocation5 + $0x48] sm:$0xff]   ;;  %v2232_v44 = vld [vmem:[#allocation5 + $0xd0] sm:$0xff]   ;;  %vm2487_vm0 = vmmov 0   ;;  %vm916_vm1 = vcmask 523264  }
  0x61   :  { %v2224_v35 = vld [vmem:[#allocation5 + $0xc0] sm:$0xff]   ;;  %v2228_v40 = vld [vmem:[#allocation5 + $0xc8] sm:$0xff]   ;;  %v2233_v45 = vld [vmem:[#allocation5 + $0x10] sm:$0xff]   ;;  %v151_v7 = vsub.s32 0, %v2647_v6  ;;  %v159_v8 = vsub.s32 2, %v2647_v6  ;;  %v155_v10 = vsub.s32 1, %v2647_v6 }
  0x62   :  { %v2225_v36 = vld [vmem:[#allocation5] sm:$0xff]   ;;  %v2229_v41 = vld [vmem:[#allocation5 + $0x8] sm:$0xff]   ;;  %v2234_v46 = vld [vmem:[#allocation5 + $0x90] sm:$0xff]   ;;  %v163_v11 = vsub.s32 3, %v2647_v6 }
  0x63   :  { %336 = vmatpush1.bf16.msra.mxu0 %v2197_v15  ;;  %377 = vmatpush1.bf16.msra.mxu1 %v2198_v16  ;;  %v2226_v38 = vld [vmem:[#allocation5 + $0x80] sm:$0xff]   ;;  %v2230_v42 = vld [vmem:[#allocation5 + $0x88] sm:$0xff]   ;;  %v2235_v47 = vld [vmem:[#allocation5 + $0x58] sm:$0xff]  }
  0x64   :  { %337 = vmatprep.subr.bf16.mxu0 %v2199_v17  ;;  %378 = vmatprep.subr.bf16.mxu1 %v2201_v18  ;;  %v2236_v48 = vld [vmem:[#allocation5 + $0xd8] sm:$0xff]   ;;  %v2239_v51 = vld [vmem:[#allocation5 + $0x60] sm:$0xff]   ;;  %v2243_v55 = vld [vmem:[#allocation5 + $0x68] sm:$0xff]  }
  0x65   :  { %v2237_v49 = vld [vmem:[#allocation5 + $0x18] sm:$0xff]   ;;  %v2240_v52 = vld [vmem:[#allocation5 + $0xe0] sm:$0xff]   ;;  %v2244_v56 = vld [vmem:[#allocation5 + $0xe8] sm:$0xff]  }
  0x66   :  { %v2238_v50 = vld [vmem:[#allocation5 + $0x98] sm:$0xff]   ;;  %v2241_v53 = vld [vmem:[#allocation5 + $0x20] sm:$0xff]   ;;  %v2245_v57 = vld [vmem:[#allocation5 + $0x28] sm:$0xff]  }
  0x67   :  { %338 = vmatpush1.bf16.msra.mxu0 %v2203_v19  ;;  %379 = vmatpush1.bf16.msra.mxu1 %v2204_v20  ;;  %v2242_v54 = vld [vmem:[#allocation5 + $0xa0] sm:$0xff]   ;;  %v2246_v58 = vld [vmem:[#allocation5 + $0xa8] sm:$0xff]   ;;  %v2247_v59 = vld [vmem:[#allocation5 + $0x70] sm:$0xff]  }
  0x68   :  { %339 = vmatprep.subr.bf16.mxu0 %v2205_v21  ;;  %380 = vmatprep.subr.bf16.mxu1 %v2207_v22  ;;  %v2248_v60 = vld [vmem:[#allocation5 + $0xf0] sm:$0xff]   ;;  %v2251_v63 = vld [vmem:[#allocation5 + $0x78] sm:$0xff]   ;;  %v147_v9 = vld [vmem:[%s2813_s2] sm:$0xf] }
  0x69   :  { %v2249_v61 = vld [vmem:[#allocation5 + $0x30] sm:$0xff]   ;;  %v2252_v1 = vld [vmem:[#allocation5 + $0xf8] sm:$0xff]   ;;  %v152_v12 = vrot.slane %v147_v9, %v151_v7  ;;  %v160_v13 = vrot.slane %v147_v9, %v159_v8  ;;  %v156_v14 = vrot.slane %v147_v9, %v155_v10  ;;  %v164_v15 = vrot.slane %v147_v9, %v163_v11 }
  0x6a   :  { %v2250_v62 = vld [vmem:[#allocation5 + $0xb0] sm:$0xff]   ;;  %v2253_v2 = vld [vmem:[#allocation5 + $0x38] sm:$0xff]  }
  0x6b   :  { %340 = vmatpush1.bf16.msra.mxu0 %v2209_v23  ;;  %381 = vmatpush1.bf16.msra.mxu1 %v2210_v24  ;;  %v2254_v3 = vld [vmem:[#allocation5 + $0xb8] sm:$0xff]  }
  0x6c   :  { %341 = vmatprep.subr.bf16.mxu0 %v2211_v25  ;;  %382 = vmatprep.subr.bf16.mxu1 %v2213_v26 }
  0x6f   :  { %342 = vmatpush1.bf16.msra.mxu0 %v2215_v27  ;;  %383 = vmatpush1.bf16.msra.mxu1 %v2216_v28 }
  0x70   :  { %343 = vmatprep.subr.bf16.mxu0 %v2217_v29  ;;  %384 = vmatprep.subr.bf16.mxu1 %v2219_v30 }
  0x73   :  { %344 = vmatpush1.bf16.msra.mxu0 %v2221_v31  ;;  %385 = vmatpush1.bf16.msra.mxu1 %v2222_v32 }
  0x74   :  { %1983 = vmatprep.subr.bf16.mxu0 %v2223_v34  ;;  %2005 = vmatprep.subr.bf16.mxu1 %v2224_v35  ;;  %v2255_v35 = vld [vmem:[%s2816_s5] sm:$0xff]  }
  0x76   :  { %362 = vmatmul.mubr.bf16.vlgmr.msra.gmra.mrb[0].mxu0 %v114_v37  ;;  %403 = vmatmul.mubr.bf16.vlgmr.msra.gmra.mrb[0].mxu1 %v114_v37  ;;  %v2256_v37 = vld [vmem:[%s2816_s5 + $0x8] sm:$0xff]  }
  0x77   :  { %1984 = vmatpush3.bf16.msra.mxu0 %v2225_v36  ;;  %2006 = vmatpush3.bf16.msra.mxu1 %v2226_v38  ;;  %v2257_v38 = vld [vmem:[%s2816_s5 + $0x10] sm:$0xff]  }
  0x78   :  { %1985 = vmatprep.subr.bf16.mxu0 %v2227_v39  ;;  %2007 = vmatprep.subr.bf16.mxu1 %v2228_v40  ;;  %v2258_v39 = vld [vmem:[%s2816_s5 + $0x18] sm:$0xff]   ;;  %v2259_v40 = vld [vmem:[%s2816_s5 + $0x20] sm:$0xff]  }
  0x7b   :  { %1986 = vmatpush3.bf16.msra.mxu0 %v2229_v41  ;;  %2008 = vmatpush3.bf16.msra.mxu1 %v2230_v42  ;;  %v2260_v41 = vld [vmem:[%s2816_s5 + $0x28] sm:$0xff]   ;;  %v2261_v42 = vld [vmem:[%s2816_s5 + $0x30] sm:$0xff]  }
  0x7c   :  { %1987 = vmatprep.subr.bf16.mxu0 %v2231_v43  ;;  %2009 = vmatprep.subr.bf16.mxu1 %v2232_v44  ;;  %v2262_v43 = vld [vmem:[%s2816_s5 + $0x38] sm:$0xff]   ;;  %v2263_v44 = vld [vmem:[%s2818_s7] sm:$0xff]  }
  0x7f   :  { %1988 = vmatpush3.bf16.msra.mxu0 %v2233_v45  ;;  %2010 = vmatpush3.bf16.msra.mxu1 %v2234_v46  ;;  %v2264_v45 = vld [vmem:[%s2818_s7 + $0x8] sm:$0xff]  }
  0x80   :  { %1989 = vmatprep.subr.bf16.mxu0 %v2235_v47  ;;  %2011 = vmatprep.subr.bf16.mxu1 %v2236_v48  ;;  %v1855_v48 = vld [vmem:[%s2815_s4] ss:$0 sm:$0xff] }
  0x83   :  { %1990 = vmatpush3.bf16.msra.mxu0 %v2237_v49  ;;  %2012 = vmatpush3.bf16.msra.mxu1 %v2238_v50 }
  0x84   :  { %1991 = vmatprep.subr.bf16.mxu0 %v2239_v51  ;;  %2013 = vmatprep.subr.bf16.mxu1 %v2240_v52 }
  0x87   :  { %1992 = vmatpush3.bf16.msra.mxu0 %v2241_v53  ;;  %2014 = vmatpush3.bf16.msra.mxu1 %v2242_v54 }
  0x88   :  { %1993 = vmatprep.subr.bf16.mxu0 %v2243_v55  ;;  %2015 = vmatprep.subr.bf16.mxu1 %v2244_v56 }
  0x8b   :  { %1994 = vmatpush3.bf16.msra.mxu0 %v2245_v57  ;;  %2016 = vmatpush3.bf16.msra.mxu1 %v2246_v58 }
  0x8c   :  { %1995 = vmatprep.subr.bf16.mxu0 %v2247_v59  ;;  %2017 = vmatprep.subr.bf16.mxu1 %v2248_v60 }
  0x8f   :  { %1996 = vmatpush3.bf16.msra.mxu0 %v2249_v61  ;;  %2018 = vmatpush3.bf16.msra.mxu1 %v2250_v62  ;;  %v2265_v61 = vld [vmem:[%s2818_s7 + $0x10] sm:$0xff]   ;;  %v2266_v62 = vld [vmem:[%s2818_s7 + $0x18] sm:$0xff]  }
  0x90   :  { %1997 = vmatprep.subr.bf16.mxu0 %v2251_v63  ;;  %2019 = vmatprep.subr.bf16.mxu1 %v2252_v1  ;;  %v1888_v63 = vld [vmem:[%s2817_s6] ss:$0 sm:$0xff]  ;;  %s2488_s6 = smov [#allocation10]  }
  0x91   :  { %s1812_s30 = sshll.u32 %s2488_s6, 4  ;;  %s1813_s30 = int_to_ptr.vmem [resolvable:$true] %s1812_s30 }
  0x92   :  { %s2447_s17 = scalar_lea.vmem %s1813_s30, 128  ;;  %p2452_p5 = scmp.lt.s32.totalorder %s1813_s30, %s1813_s30 }
  0x93   :  { %1998 = vmatpush3.bf16.msra.mxu0 %v2253_v2  ;;  %2020 = vmatpush3.bf16.msra.mxu1 %v2254_v3  ;;  %p2448_p4 = scmp.ne.s32.totalorder %s1813_s30, %s2447_s17  ;;  %p2453_p6 = scmp.lt.s32.totalorder %s2447_s17, %s2447_s17 }
  0x94   :  { %2099 = vmatprep.subr.bf16.mxu0 %v2486_v4  ;;  %2119 = vmatprep.subr.bf16.mxu1 %v2486_v4 }
  0x95   :  { %p2454_p7 = por %p2453_p6, %p2452_p5 }
  0x97   :  { %p2455_p8 = pnand %p2454_p7, %p2448_p4 }
 0x149   :  { %v363_v16 = vpop.f32.mrb[0].mxu0  ;;  %v404_v17 = vpop.f32.mrb[0].mxu1 }
 0x14a   :  { %v364_v18 = vadd.f32 %v363_v16, %v152_v12  ;;  %v405_v19 = vadd.f32 %v404_v17, %v160_v13  ;;  %v365_v20 = vpop.f32.mrb[1].mxu0  ;;  %v406_v21 = vpop.f32.mrb[1].mxu1  ;;  %v2267_v13 = vld [vmem:[%s2820_s9] sm:$0xff]   ;;  %v2269_v16 = vld [vmem:[%s2820_s9 + $0x10] sm:$0xff]   ;;  %v2270_v17 = vld [vmem:[%s2820_s9 + $0x18] sm:$0xff]  }
 0x14b   :  { %v366_v22 = vadd.f32 %v365_v20, %v156_v14  ;;  %v407_v23 = vadd.f32 %v406_v21, %v164_v15  ;;  %v367_v24 = vpop.f32.mrb[2].mxu0  ;;  %v408_v25 = vpop.f32.mrb[2].mxu1  ;;  %v2268_v15 = vld [vmem:[%s2820_s9 + $0x8] sm:$0xff]   ;;  %v2273_v20 = vld [vmem:[%s2820_s9 + $0x30] sm:$0xff]   ;;  %v2274_v21 = vld [vmem:[%s2820_s9 + $0x38] sm:$0xff]  }
 0x14c   :  { %v411_v26 = vmax.f32 %v364_v18, 0.0  ;;  %v413_v27 = vmax.f32 %v405_v19, 0.0  ;;  %v368_v28 = vpop.f32.mrb[3].mxu0  ;;  %v409_v29 = vpop.f32.mrb[3].mxu1  ;;  %v2271_v18 = vld [vmem:[%s2820_s9 + $0x20] sm:$0xff]   ;;  %v2272_v19 = vld [vmem:[%s2820_s9 + $0x28] sm:$0xff]  }
 0x14d   :  { %v412_v30 = vmax.f32 %v366_v22, 0.0  ;;  %v414_v31 = vmax.f32 %v407_v23, 0.0  ;;  %v2275_v22 = vld [vmem:[%s2822_s11] sm:$0xff]   ;;  %v2276_v23 = vld [vmem:[%s2822_s11 + $0x8] sm:$0xff]  }
 0x14e   :  { %v417_v32 = vpack.c.bf16 %v413_v27, %v413_v27  ;;  %v415_v36 = vpack.c.bf16 %v411_v26, %v411_v26  ;;  %v1897_v24 = vld [vmem:[%s2819_s8] ss:$0 sm:$0xff] }
 0x14f   :  { %v416_v33 = vpack.c.bf16 %v412_v30, %v412_v30  ;;  %v418_v34 = vpack.c.bf16 %v414_v31, %v414_v31  ;;  %v2277_v31 = vld [vmem:[%s2822_s11 + $0x10] sm:$0xff]  }
 0x151   :  { %714 = vmatprep.mubr.bf16.mxu0 %v416_v33  ;;  %754 = vmatprep.mubr.bf16.mxu1 %v418_v34  ;;  %v2281_v33 = vld [vmem:[#allocation7 + $0x4] ss:$16 sps:$4 sm:$0xff]   ;;  %v2282_v34 = vld [vmem:[#allocation7 + $0x8] ss:$16 sps:$4 sm:$0xff]  }
 0x152   :  { %715 = vmatmul.mubr.bf16.vlgmr.msra.gmra.mrb[4].mxu0 %v415_v36  ;;  %755 = vmatmul.mubr.bf16.vlgmr.msra.gmra.mrb[4].mxu1 %v417_v32  ;;  %v2278_v32 = vld [vmem:[%s2822_s11 + $0x18] sm:$0xff]  }
 0x153   :  { %2100 = vmatpush3.bf16.msra.mxu0 %v2255_v35  ;;  %2115 = vmatprep.mubr.msk.bf16.mxu0 %vm2487_vm0, %v2486_v4  ;;  %v2284_v35 = vld [vmem:[#allocation7 + $0xc] ss:$16 sps:$4 sm:$0xff]  }
 0x154   :  { %2101 = vmatprep.subr.bf16.mxu0 %v2486_v4  ;;  %2127 = vmatprep.mubr.msk.bf16.mxu1 %vm2487_vm0, %v2486_v4  ;;  %v2290_v36 = vld [vmem:[#allocation7 + $0x2c] ss:$16 sps:$4 sm:$0xff]  }
 0x155   :  { %2120 = vmatpush3.bf16.msra.mxu1 %v2263_v44  ;;  %v2312_v44 = vld [vmem:[#allocation7 + $0xa8] ss:$16 sps:$4 sm:$0xff]  }
 0x156   :  { %2121 = vmatprep.subr.bf16.mxu1 %v2486_v4 }
 0x157   :  { %2102 = vmatpush3.bf16.msra.mxu0 %v2256_v37  ;;  %v2288_v37 = vld [vmem:[#allocation7 + $0x28] ss:$16 sps:$4 sm:$0xff]  }
 0x158   :  { %2103 = vmatprep.subr.bf16.mxu0 %v2486_v4 }
 0x159   :  { %2122 = vmatpush3.bf16.msra.mxu1 %v2264_v45  ;;  %v2320_v45 = vld [vmem:[#allocation7 + $0xcc] ss:$16 sps:$4 sm:$0xff]  }
 0x15a   :  { %2123 = vmatprep.subr.bf16.mxu1 %v2486_v4 }
 0x15b   :  { %2104 = vmatpush3.bf16.msra.mxu0 %v2257_v38  ;;  %v2296_v38 = vld [vmem:[#allocation7 + $0x4c] ss:$16 sps:$4 sm:$0xff]  }
 0x15c   :  { %2105 = vmatprep.subr.bf16.mxu0 %v2486_v4 }
 0x15d   :  { %2124 = vmatpush3.bf16.msra.mxu1 %v2265_v61  ;;  %v2297_v61 = vld [vmem:[#allocation7 + $0x60] ss:$16 sps:$4 sm:$0xff]  }
 0x15e   :  { %2125 = vmatprep.subr.bf16.mxu1 %v2486_v4 }
 0x15f   :  { %2106 = vmatpush3.bf16.msra.mxu0 %v2258_v39  ;;  %v2294_v39 = vld [vmem:[#allocation7 + $0x48] ss:$16 sps:$4 sm:$0xff]  }
 0x160   :  { %2107 = vmatprep.subr.bf16.mxu0 %v2486_v4 }
 0x161   :  { %2126 = vmatpush3.bf16.msra.mxu1 %v2266_v62  ;;  %v2305_v62 = vld [vmem:[#allocation7 + $0x84] ss:$16 sps:$4 sm:$0xff]  }
 0x162   :  { %2131 = vmatprep.subr.bf16.mxu1 %v2486_v4 }
 0x163   :  { %2108 = vmatpush3.bf16.msra.mxu0 %v2259_v40  ;;  %v2302_v40 = vld [vmem:[#allocation7 + $0x6c] ss:$16 sps:$4 sm:$0xff]  }
 0x164   :  { %2109 = vmatprep.subr.bf16.mxu0 %v2486_v4 }
 0x167   :  { %2110 = vmatpush3.bf16.msra.mxu0 %v2260_v41  ;;  %v2308_v41 = vld [vmem:[#allocation7 + $0x8c] ss:$16 sps:$4 sm:$0xff]  }
 0x168   :  { %2111 = vmatprep.subr.bf16.mxu0 %v2486_v4 }
 0x16b   :  { %2112 = vmatpush3.bf16.msra.mxu0 %v2261_v42  ;;  %v2306_v42 = vld [vmem:[#allocation7 + $0x88] ss:$16 sps:$4 sm:$0xff]  }
 0x16c   :  { %2113 = vmatprep.subr.bf16.mxu0 %v2486_v4 }
 0x16f   :  { %2114 = vmatpush3.bf16.msra.mxu0 %v2262_v43  ;;  %v2314_v43 = vld [vmem:[#allocation7 + $0xac] ss:$16 sps:$4 sm:$0xff]  }
 0x170   :  { %2151 = vmatprep.subr.bf16.mxu0 %v2486_v4 }
 0x225   :  { %v1999_v46 = vpop.f32.mrb[4].mxu0  ;;  %v2021_v47 = vpop.f32.mrb[4].mxu1 }
 0x226   :  { %v2000_v49 = vpop.f32.mrb[5].mxu0  ;;  %v2022_v50 = vpop.f32.mrb[5].mxu1 }
 0x227   :  { %v2001_v51 = vadd.f32 %v2000_v49, %v1999_v46  ;;  %v2023_v52 = vadd.f32 %v2022_v50, %v2021_v47  ;;  %v2002_v53 = vpop.f32.mrb[6].mxu0  ;;  %v2024_v54 = vpop.f32.mrb[6].mxu1  ;;  %v2318_v46 = vld [vmem:[#allocation7 + $0xc8] ss:$16 sps:$4 sm:$0xff]   ;;  %v1903_v47 = vld [vmem:[%s2821_s10] ss:$0 sm:$0xff] }
 0x228   :  { %v2003_v55 = vpop.f32.mrb[7].mxu0  ;;  %v2025_v56 = vpop.f32.mrb[7].mxu1  ;;  %v2279_v54 = vld [vmem:[#allocation7] ss:$16 sps:$4 sm:$0xff]  }
 0x229   :  { %v717_v57 = vadd.f32 %v2001_v51, %v1855_v48  ;;  %v2287_v56 = vld [vmem:[#allocation7 + $0x24] ss:$16 sps:$4 sm:$0xff]  }
 0x22b   :  { %v757_v58 = vadd.f32 %v2023_v52, %v717_v57  ;;  %v2285_v57 = vld [vmem:[#allocation7 + $0x20] ss:$16 sps:$4 sm:$0xff]  }
 0x22d   :  { %v762_v59 = vmax.f32 %v757_v58, 0.0  ;;  %v2293_v58 = vld [vmem:[#allocation7 + $0x44] ss:$16 sps:$4 sm:$0xff]  }
 0x22f   :  { %v763_v60 = vpack.c.bf16 %v762_v59, %v762_v59  ;;  %v2291_v59 = vld [vmem:[#allocation7 + $0x40] ss:$16 sps:$4 sm:$0xff]  }
 0x231   :  { %2116 = vmatmul.mubr.bf16.vlgmr.msra.gmra.mrb[8].mxu0 %v763_v60  ;;  %v2299_v60 = vld [vmem:[#allocation7 + $0x64] ss:$16 sps:$4 sm:$0xff]  }
 0x232   :  { %2159 = vmatprep.mubr.msk.bf16.mxu0 %vm2487_vm0, %v2486_v4  ;;  %2152 = vmatpush3.bf16.msra.mxu0 %v2275_v22 }
 0x233   :  { %2153 = vmatprep.subr.bf16.mxu0 %v2486_v4 }
 0x236   :  { %2154 = vmatpush3.bf16.msra.mxu0 %v2276_v23  ;;  %v2329_v23 = vld [vmem:[#allocation8] sm:$0xff]  }
 0x237   :  { %2155 = vmatprep.subr.bf16.mxu0 %v2486_v4 }
 0x23a   :  { %2156 = vmatpush3.bf16.msra.mxu0 %v2277_v31  ;;  %v2336_v31 = vld [vmem:[#allocation8 + $0xd0] sm:$0xff]  }
 0x23b   :  { %2157 = vmatprep.subr.bf16.mxu0 %v2486_v4 }
 0x23e   :  { %2158 = vmatpush3.bf16.msra.mxu0 %v2278_v32  ;;  %v2337_v32 = vld [vmem:[#allocation8 + $0x10] sm:$0xff]  }
 0x23f   :  { %1372 = vmatprep.subr.bf16.mxu0 %v2281_v33  ;;  %v2338_v33 = vld [vmem:[#allocation8 + $0x90] sm:$0xff]  }
 0x304   :  { %v869_v1 = vpop.f32.mrb[8].mxu0 }
 0x305   :  { %v870_v2 = vadd.f32 %v1888_v63, %v869_v1  ;;  %v2117_v3 = vpop.f32.mrb[9].mxu0  ;;  %v2303_v63 = vld [vmem:[#allocation7 + $0x80] ss:$16 sps:$4 sm:$0xff]   ;;  %v2311_v1 = vld [vmem:[#allocation7 + $0xa4] ss:$16 sps:$4 sm:$0xff]  }
 0x306   :  { %v872_v5 = vpop.f32.mrb[10].mxu0  ;;  %v2317_v3 = vld [vmem:[#allocation7 + $0xc4] ss:$16 sps:$4 sm:$0xff]  }
 0x307   :  { %v875_v9 = vmax.f32 %v870_v2, 0.0  ;;  %v2118_v12 = vpop.f32.mrb[11].mxu0  ;;  %v2309_v2 = vld [vmem:[#allocation7 + $0xa0] ss:$16 sps:$4 sm:$0xff]   ;;  %v2323_v5 = vld [vmem:[#allocation7 + $0xe4] ss:$16 sps:$4 sm:$0xff]  }
 0x308   :  { %v2321_v12 = vld [vmem:[#allocation7 + $0xe0] ss:$16 sps:$4 sm:$0xff]  }
 0x309   :  { %v876_v14 = vpack.c.bf16 %v875_v9, %v875_v9  ;;  %v2326_v9 = vld [vmem:[#allocation7 + $0xec] ss:$16 sps:$4 sm:$0xff]  }
 0x30b   :  { %2128 = vmatmul.mubr.msk.bf16.vlgmr.msra.gmra.mrb[8].mxu1 %vm916_vm1, %v876_v14  ;;  %v2327_v14 = vld [vmem:[#allocation8 + $0x40] sm:$0xff]  }
 0x30c   :  { %2132 = vmatpush3.bf16.msra.mxu1 %v2267_v13  ;;  %2147 = vmatprep.mubr.msk.bf16.mxu1 %vm2487_vm0, %v2486_v4  ;;  %v2324_v13 = vld [vmem:[#allocation7 + $0xe8] ss:$16 sps:$4 sm:$0xff]  }
 0x30d   :  { %2133 = vmatprep.subr.bf16.mxu1 %v2486_v4 }
 0x310   :  { %2134 = vmatpush3.bf16.msra.mxu1 %v2268_v15  ;;  %v2328_v15 = vld [vmem:[#allocation8 + $0xc0] sm:$0xff]  }
 0x311   :  { %2135 = vmatprep.subr.bf16.mxu1 %v2486_v4 }
 0x314   :  { %2136 = vmatpush3.bf16.msra.mxu1 %v2269_v16  ;;  %v1912_v16 = vld [vmem:[%s2823_s12] ss:$0 sm:$0xff] }
 0x315   :  { %2137 = vmatprep.subr.bf16.mxu1 %v2486_v4 }
 0x318   :  { %2138 = vmatpush3.bf16.msra.mxu1 %v2270_v17 }
 0x319   :  { %2139 = vmatprep.subr.bf16.mxu1 %v2486_v4 }
 0x31c   :  { %2140 = vmatpush3.bf16.msra.mxu1 %v2271_v18 }
 0x31d   :  { %2141 = vmatprep.subr.bf16.mxu1 %v2486_v4 }
 0x320   :  { %2142 = vmatpush3.bf16.msra.mxu1 %v2272_v19 }
 0x321   :  { %2143 = vmatprep.subr.bf16.mxu1 %v2486_v4 }
 0x324   :  { %2144 = vmatpush3.bf16.msra.mxu1 %v2273_v20 }
 0x325   :  { %2145 = vmatprep.subr.bf16.mxu1 %v2486_v4  ;;  %v2300_v4 = vld [vmem:[#allocation7 + $0x68] ss:$16 sps:$4 sm:$0xff]  }
 0x328   :  { %2146 = vmatpush3.bf16.msra.mxu1 %v2274_v21 }
 0x329   :  { %1413 = vmatprep.subr.bf16.mxu1 %v2284_v35  ;;  %v2340_v35 = vld [vmem:[#allocation8 + $0xd8] sm:$0xff]  }
 0x3de   :  { %v954_v25 = vpop.f32.mrb[8].mxu1 }
 0x3df   :  { %v955_v26 = vadd.f32 %v1897_v24, %v954_v25  ;;  %v2129_v27 = vpop.f32.mrb[9].mxu1  ;;  %v2330_v24 = vld [vmem:[#allocation8 + $0x80] sm:$0xff]  }
 0x3e0   :  { %v957_v28 = vpop.f32.mrb[10].mxu1  ;;  %v2332_v27 = vld [vmem:[#allocation8 + $0xc8] sm:$0xff]  }
 0x3e1   :  { %v960_v29 = vpack.c.bf16 %v955_v26, %v955_v26  ;;  %v2130_v30 = vpop.f32.mrb[11].mxu1  ;;  %v2331_v26 = vld [vmem:[#allocation8 + $0x48] sm:$0xff]  }
 0x3e2   :  { %v2333_v28 = vld [vmem:[#allocation8 + $0x8] sm:$0xff]   ;;  %v2335_v30 = vld [vmem:[#allocation8 + $0x50] sm:$0xff]  }
 0x3e3   :  { %2148 = vmatmul.mubr.bf16.vlgmr.msra.gmra.mrb[12].mxu1 %v960_v29  ;;  %v2334_v29 = vld [vmem:[#allocation8 + $0x88] sm:$0xff]  }
 0x3e4   :  { %1445 = vmatprep.mubr.bf16.mxu1 %v2485_v0  ;;  %1414 = vmatpush1.bf16.msra.mxu1 %v2282_v34  ;;  %v2339_v34 = vld [vmem:[#allocation8 + $0x58] sm:$0xff]  }
 0x3e5   :  { %1415 = vmatprep.subr.bf16.mxu1 %v2290_v36  ;;  %v2341_v36 = vld [vmem:[#allocation8 + $0x18] sm:$0xff]  }
 0x3e8   :  { %1416 = vmatpush1.bf16.msra.mxu1 %v2288_v37  ;;  %v2342_v37 = vld [vmem:[#allocation8 + $0x98] sm:$0xff]  }
 0x3e9   :  { %1417 = vmatprep.subr.bf16.mxu1 %v2296_v38  ;;  %v2343_v38 = vld [vmem:[#allocation8 + $0x60] sm:$0xff]  }
 0x3ec   :  { %1418 = vmatpush1.bf16.msra.mxu1 %v2294_v39  ;;  %v2344_v39 = vld [vmem:[#allocation8 + $0xe0] sm:$0xff]  }
 0x3ed   :  { %1419 = vmatprep.subr.bf16.mxu1 %v2302_v40  ;;  %v2345_v40 = vld [vmem:[#allocation8 + $0x20] sm:$0xff]  }
 0x3f0   :  { %1420 = vmatpush1.bf16.msra.mxu1 %v2300_v4  ;;  %v2346_v4 = vld [vmem:[#allocation8 + $0xa0] sm:$0xff]  }
 0x3f1   :  { %1421 = vmatprep.subr.bf16.mxu1 %v2308_v41  ;;  %v2347_v41 = vld [vmem:[#allocation8 + $0x68] sm:$0xff]  }
 0x3f4   :  { %1422 = vmatpush1.bf16.msra.mxu1 %v2306_v42  ;;  %v2348_v42 = vld [vmem:[#allocation8 + $0xe8] sm:$0xff]  }
 0x3f5   :  { %1423 = vmatprep.subr.bf16.mxu1 %v2314_v43  ;;  %v2349_v43 = vld [vmem:[#allocation8 + $0x28] sm:$0xff]  }
 0x3f8   :  { %1424 = vmatpush1.bf16.msra.mxu1 %v2312_v44  ;;  %v2350_v44 = vld [vmem:[#allocation8 + $0xa8] sm:$0xff]  }
 0x3f9   :  { %1425 = vmatprep.subr.bf16.mxu1 %v2320_v45  ;;  %v2351_v45 = vld [vmem:[#allocation8 + $0x70] sm:$0xff]  }
 0x3fc   :  { %1426 = vmatpush1.bf16.msra.mxu1 %v2318_v46  ;;  %v2352_v46 = vld [vmem:[#allocation8 + $0xf0] sm:$0xff]  }
 0x3fd   :  { %1427 = vmatprep.subr.bf16.mxu1 %v2326_v9 }
 0x400   :  { %1428 = vmatpush1.bf16.msra.mxu1 %v2324_v13 }
 0x401   :  { %2077 = vmatprep.subr.bf16.mxu1 %v2328_v15 }
 0x4b6   :  { %v1066_v48 = vpop.f32.mrb[12].mxu1 }
 0x4b7   :  { %v1067_v49 = vadd.f32 %v1903_v47, %v1066_v48  ;;  %v2149_v50 = vpop.f32.mrb[13].mxu1  ;;  %v2353_v47 = vld [vmem:[#allocation8 + $0x30] sm:$0xff]  }
 0x4b8   :  { %v1069_v51 = vpop.f32.mrb[14].mxu1  ;;  %v2354_v48 = vld [vmem:[#allocation8 + $0xb0] sm:$0xff]   ;;  %v2356_v50 = vld [vmem:[#allocation8 + $0xf8] sm:$0xff]  }
 0x4b9   :  { %v1072_v52 = vmax.f32 %v1067_v49, 0.0  ;;  %v2150_v53 = vpop.f32.mrb[15].mxu1  ;;  %v2355_v49 = vld [vmem:[#allocation8 + $0x78] sm:$0xff]  }
 0x4ba   :  { %v2357_v51 = vld [vmem:[#allocation8 + $0x38] sm:$0xff]   ;;  %v1190_v53 = vld [vmem:[%s2825_s14] sm:$0xf] }
 0x4bb   :  { %v1073_v55 = vpack.c.bf16 %v1072_v52, %v1072_v52  ;;  %v2358_v52 = vld [vmem:[#allocation8 + $0xb8] sm:$0xff]  }
 0x4bd   :  { %2160 = vmatmul.mubr.msk.bf16.vlgmr.msra.gmra.mrb[12].mxu0 %vm916_vm1, %v1073_v55  ;;  %v1203_v55 = vrot.slane %v1190_v53, %v159_v8 }
 0x4be   :  { %1373 = vmatpush1.bf16.msra.mxu0 %v2279_v54  ;;  %1404 = vmatprep.mubr.bf16.mxu0 %v2485_v0  ;;  %v2315_v0 = vld [vmem:[#allocation7 + $0xc0] ss:$16 sps:$4 sm:$0xff]   ;;  %v1195_v54 = vrot.slane %v1190_v53, %v151_v7 }
 0x4bf   :  { %1374 = vmatprep.subr.bf16.mxu0 %v2287_v56  ;;  %v1199_v56 = vrot.slane %v1190_v53, %v155_v10 }
 0x4c2   :  { %1375 = vmatpush1.bf16.msra.mxu0 %v2285_v57  ;;  %v1207_v57 = vrot.slane %v1190_v53, %v163_v11 }
 0x4c3   :  { %1376 = vmatprep.subr.bf16.mxu0 %v2293_v58 }
 0x4c6   :  { %1377 = vmatpush1.bf16.msra.mxu0 %v2291_v59 }
 0x4c7   :  { %1378 = vmatprep.subr.bf16.mxu0 %v2299_v60 }
 0x4ca   :  { %1379 = vmatpush1.bf16.msra.mxu0 %v2297_v61 }
 0x4cb   :  { %1380 = vmatprep.subr.bf16.mxu0 %v2305_v62 }
 0x4ce   :  { %1381 = vmatpush1.bf16.msra.mxu0 %v2303_v63 }
 0x4cf   :  { %1382 = vmatprep.subr.bf16.mxu0 %v2311_v1 }
 0x4d2   :  { %1383 = vmatpush1.bf16.msra.mxu0 %v2309_v2 }
 0x4d3   :  { %1384 = vmatprep.subr.bf16.mxu0 %v2317_v3 }
 0x4d6   :  { %1385 = vmatpush1.bf16.msra.mxu0 %v2315_v0 }
 0x4d7   :  { %1386 = vmatprep.subr.bf16.mxu0 %v2323_v5 }
 0x4da   :  { %1387 = vmatpush1.bf16.msra.mxu0 %v2321_v12 }
 0x4db   :  { %2055 = vmatprep.subr.bf16.mxu0 %v2327_v14 }
 0x590   :  { %v1150_v17 = vpop.f32.mrb[12].mxu0 }
 0x591   :  { %v1151_v18 = vadd.f32 %v1912_v16, %v1150_v17  ;;  %v2161_v19 = vpop.f32.mrb[13].mxu0  ;;  %v1950_v17 = vld [vmem:[%s2827_s16] ss:$0 sm:$0xff] }
 0x592   :  { %v1153_v20 = vpop.f32.mrb[14].mxu0 }
 0x593   :  { %v1156_v21 = vmax.f32 %v1151_v18, 0.0  ;;  %v2162_v22 = vpop.f32.mrb[15].mxu0 }
 0x595   :  { %v1157_v25 = vpack.c.bf16 %v1156_v21, %v1156_v21 }
 0x597   :  { %1405 = vmatmul.mubr.bf16.vlgmr.msra.gmra.mrb[16].mxu0 %v1157_v25  ;;  %1446 = vmatmul.mubr.bf16.vlgmr.msra.gmra.mrb[16].mxu1 %v1157_v25 }
 0x598   :  { %2056 = vmatpush3.bf16.msra.mxu0 %v2329_v23  ;;  %2078 = vmatpush3.bf16.msra.mxu1 %v2330_v24 }
 0x599   :  { %2057 = vmatprep.subr.bf16.mxu0 %v2331_v26  ;;  %2079 = vmatprep.subr.bf16.mxu1 %v2332_v27 }
 0x59c   :  { %2058 = vmatpush3.bf16.msra.mxu0 %v2333_v28  ;;  %2080 = vmatpush3.bf16.msra.mxu1 %v2334_v29 }
 0x59d   :  { %2059 = vmatprep.subr.bf16.mxu0 %v2335_v30  ;;  %2081 = vmatprep.subr.bf16.mxu1 %v2336_v31 }
 0x5a0   :  { %2060 = vmatpush3.bf16.msra.mxu0 %v2337_v32  ;;  %2082 = vmatpush3.bf16.msra.mxu1 %v2338_v33 }
 0x5a1   :  { %2061 = vmatprep.subr.bf16.mxu0 %v2339_v34  ;;  %2083 = vmatprep.subr.bf16.mxu1 %v2340_v35 }
 0x5a4   :  { %2062 = vmatpush3.bf16.msra.mxu0 %v2341_v36  ;;  %2084 = vmatpush3.bf16.msra.mxu1 %v2342_v37 }
 0x5a5   :  { %2063 = vmatprep.subr.bf16.mxu0 %v2343_v38  ;;  %2085 = vmatprep.subr.bf16.mxu1 %v2344_v39 }
 0x5a8   :  { %2064 = vmatpush3.bf16.msra.mxu0 %v2345_v40  ;;  %2086 = vmatpush3.bf16.msra.mxu1 %v2346_v4 }
 0x5a9   :  { %2065 = vmatprep.subr.bf16.mxu0 %v2347_v41  ;;  %2087 = vmatprep.subr.bf16.mxu1 %v2348_v42 }
 0x5ac   :  { %2066 = vmatpush3.bf16.msra.mxu0 %v2349_v43  ;;  %2088 = vmatpush3.bf16.msra.mxu1 %v2350_v44 }
 0x5ad   :  { %2067 = vmatprep.subr.bf16.mxu0 %v2351_v45  ;;  %2089 = vmatprep.subr.bf16.mxu1 %v2352_v46 }
 0x5b0   :  { %2068 = vmatpush3.bf16.msra.mxu0 %v2353_v47  ;;  %2090 = vmatpush3.bf16.msra.mxu1 %v2354_v48 }
 0x5b1   :  { %2069 = vmatprep.subr.bf16.mxu0 %v2355_v49  ;;  %2091 = vmatprep.subr.bf16.mxu1 %v2356_v50 }
 0x5b4   :  { %2070 = vmatpush3.bf16.msra.mxu0 %v2357_v51  ;;  %2092 = vmatpush3.bf16.msra.mxu1 %v2358_v52 }
 0x66a   :  { %v1406_v58 = vpop.f32.mrb[16].mxu0  ;;  %v1447_v59 = vpop.f32.mrb[16].mxu1 }
 0x66b   :  { %v1407_v60 = vadd.f32 %v1406_v58, %v1195_v54  ;;  %v1448_v61 = vadd.f32 %v1447_v59, %v1203_v55  ;;  %v1408_v62 = vpop.f32.mrb[17].mxu0  ;;  %v1449_v63 = vpop.f32.mrb[17].mxu1 }
 0x66c   :  { %v1409_v1 = vadd.f32 %v1408_v62, %v1199_v56  ;;  %v1450_v2 = vadd.f32 %v1449_v63, %v1207_v57  ;;  %v1410_v3 = vpop.f32.mrb[18].mxu0  ;;  %v1451_v0 = vpop.f32.mrb[18].mxu1 }
 0x66d   :  { %v1454_v7 = vmax.f32 %v1407_v60, 0.0  ;;  %v1456_v5 = vmax.f32 %v1448_v61, 0.0  ;;  %v1411_v9 = vpop.f32.mrb[19].mxu0  ;;  %v1452_v8 = vpop.f32.mrb[19].mxu1 }
 0x66e   :  { %v1455_v12 = vmax.f32 %v1409_v1, 0.0  ;;  %v1457_v13 = vmax.f32 %v1450_v2, 0.0 }
 0x66f   :  { %v1458_v6 = vpack.c.bf16 %v1454_v7, %v1454_v7  ;;  %v1460_v11 = vpack.c.bf16 %v1456_v5, %v1456_v5 }
 0x670   :  { %v1459_v10 = vpack.c.bf16 %v1455_v12, %v1455_v12  ;;  %v1461_v14 = vpack.c.bf16 %v1457_v13, %v1457_v13 }
 0x672   :  { %1757 = vmatprep.mubr.bf16.mxu0 %v1459_v10  ;;  %1797 = vmatprep.mubr.bf16.mxu1 %v1461_v14 }
 0x673   :  { %1758 = vmatmul.mubr.bf16.vlgmr.msra.gmra.mrb[20].mxu0 %v1458_v6  ;;  %1798 = vmatmul.mubr.bf16.vlgmr.msra.gmra.mrb[20].mxu1 %v1460_v11 }
 0x746   :  { %v2071_v15 = vpop.f32.mrb[20].mxu0  ;;  %v2093_v16 = vpop.f32.mrb[20].mxu1 }
 0x747   :  { %v2072_v18 = vpop.f32.mrb[21].mxu0  ;;  %v2094_v19 = vpop.f32.mrb[21].mxu1 }
 0x748   :  { %v2073_v20 = vadd.f32 %v2072_v18, %v2071_v15  ;;  %v2095_v21 = vadd.f32 %v2094_v19, %v2093_v16  ;;  %v2074_v22 = vpop.f32.mrb[22].mxu0  ;;  %v2096_v23 = vpop.f32.mrb[22].mxu1 }
 0x749   :  { %v2075_v24 = vpop.f32.mrb[23].mxu0  ;;  %v2097_v25 = vpop.f32.mrb[23].mxu1 }
 0x74a   :  { %v1760_v26 = vadd.f32 %v2073_v20, %v1950_v17 }
 0x74c   :  { %v1800_v27 = vadd.f32 %v2095_v21, %v1760_v26 }
 0x74e   :  { %1805 = vst [vmem:[#allocation10] sm:$0xff] %v1800_v27 }
 0x74f   :  { %2458 = shalt.err (!%p2455_p8)
}
 0x750   :  { %s2840_s3 = sld [smem:[#allocation17_spill]] }
 0x756   :  { %s2459_s25 = scalar_lea.hbm %s2840_s3, 128 }
 0x757   :  { %p2460_p9 = scmp.ne.s32.totalorder %s2840_s3, %s2459_s25  ;;  %p2463_p10 = scmp.lt.u32.totalorder %s2459_s25, %s2840_s3 }
 0x759   :  { %p2465_p11 = pnand %p2463_p10, %p2460_p9 }
 0x75b   :  { %2468 = shalt.err (!%p2465_p11)
}
 0x75c   :  { %1815 = dma.vmem_to_hbm [thread:$0]  %s1813_s30, 128, %s2840_s3, [#allocation4]  }
 0x75d   :  { %2475 = dma.done.wait [#allocation4], 128  }
 0x75e   :  { %2476 = vsyncadd [#allocation4], 4294967168 }
 0x75f   :  { %1819 = vsyncpa [#allocation3], 1 }
 0x760   :  { %1820 = vsyncpa [#allocation6], 1 }
 0x761   :  { %1821 = vsyncpa [#allocation9], 1 }
 0x762   :  { %1822 = vsyncpa [#allocation4], 1 }

</bundles_post_ra>
